<compile_context>
chip_gen: v7x
topology: tpu7x:2x2x1
jax: 0.10.0
libtpu: 0.0.40
codegen_flags: <defaults>
</compile_context>

<pallas_src>
import jax
import jax.numpy as jnp
from jax.experimental import pallas as pl
from jax.experimental.pallas import tpu as pltpu


TARGET_BLOCK_BYTES = 2 * 1024 * 1024   # ~2 MiB of x per block (measured sweet spot)


def _wscale_kernel(scale_ref, b_ref, x_ref, o_ref):
    # scale_ref: SMEM (1,) scalar. b_ref broadcasts against x_ref's block:
    #   "nc"    layout: b_ref (1, tc, 1)  vs x_ref (1, tc, HW)
    #   "lanes" layout: b_ref (1, tl)     vs x_ref (N, tl)
    o_ref[...] = x_ref[...] * scale_ref[0] + b_ref[...]


def _largest_tile(total, granule, limit):
    """Largest multiple of `granule` that divides `total` and is <= limit."""
    limit = max(granule, min(limit, total))
    limit -= limit % granule
    for cand in range(limit, granule - 1, -granule):
        if total % cand == 0:
            return cand
    return granule


def wscale_forward(x, scale, b):
    """x: (N, C, H, W); scale: (1,); b: (C,). Returns x * scale + b[None,:,None,None]."""
    N, C, H, W = x.shape
    HW = H * W
    itemsize = x.dtype.itemsize
    scale = scale.astype(x.dtype)
    b = b.astype(x.dtype)
    # Sublane granule grows with dtype packing: 8 (f32), 16 (bf16), 32 (int8/fp8).
    gran = 8 * (4 // itemsize)

    if HW % 128 == 0:
        # ------------- layout "nc": (N, C, HW), grid = (C-tiles, N) -------------
        if C % gran == 0:
            limit = max(gran, TARGET_BLOCK_BYTES // (HW * itemsize))
            if N == 1 and C >= 2 * gran:
                limit = min(limit, C // 2)   # guarantee >=2 grid steps (v7x dual-TC)
            tc = _largest_tile(C, gran, limit)
        else:
            tc = C                           # full-extent C block (always legal)
        x3 = x.reshape(N, C, HW)
        b3 = b.reshape(1, C, 1)
        grid = (C // tc, N)                  # N is the inner axis -> bias block resident per C-tile
        out3 = pl.pallas_call(
            _wscale_kernel,
            out_shape=jax.ShapeDtypeStruct((N, C, HW), x.dtype),
            grid_spec=pltpu.PrefetchScalarGridSpec(
                num_scalar_prefetch=0,
                grid=grid,
                in_specs=[
                    pl.BlockSpec(memory_space=pltpu.SMEM),               # scale (1,)
                    pl.BlockSpec((1, tc, 1), lambda c, n: (0, c, 0)),    # bias, resident across n
                    pl.BlockSpec((1, tc, HW), lambda c, n: (n, c, 0)),   # x tile (<= ~2 MiB)
                ],
                out_specs=pl.BlockSpec((1, tc, HW), lambda c, n: (n, c, 0)),
            ),
            compiler_params=pltpu.CompilerParams(
                dimension_semantics=("parallel", "parallel")),
            input_output_aliases={2: 0},     # reuse x's buffer for the output
        )(scale, b3, x3)
        return out3.reshape(N, C, H, W)

    # ------------- layout "lanes": fold C (and spatial) into the lane axis -------------
    L = C * HW
    Lp = ((L + 127) // 128) * 128
    x2 = x.reshape(N, L)
    b2 = jnp.repeat(b, HW)[None, :]          # (1, C*HW): each channel's bias repeated HW times
    if Lp != L:
        x2 = jnp.pad(x2, ((0, 0), (0, Lp - L)))
        b2 = jnp.pad(b2, ((0, 0), (0, Lp - L)))
    limit = max(128, TARGET_BLOCK_BYTES // (N * itemsize))
    if Lp >= 256:
        limit = min(limit, Lp // 2)          # guarantee >=2 grid steps (v7x dual-TC)
    tl = _largest_tile(Lp, 128, limit)
    grid = (Lp // tl,)
    # NOTE: the row (N) axis is kept whole; batch sizes for this module are small.
    out2 = pl.pallas_call(
        _wscale_kernel,
        out_shape=jax.ShapeDtypeStruct((N, Lp), x.dtype),
        grid_spec=pltpu.PrefetchScalarGridSpec(
            num_scalar_prefetch=0,
            grid=grid,
            in_specs=[
                pl.BlockSpec(memory_space=pltpu.SMEM),          # scale (1,)
                pl.BlockSpec((1, tl), lambda j: (0, j)),        # per-lane bias tile
                pl.BlockSpec((N, tl), lambda j: (0, j)),        # x tile (lane-dense)
            ],
            out_specs=pl.BlockSpec((N, tl), lambda j: (0, j)),
        ),
        compiler_params=pltpu.CompilerParams(
            dimension_semantics=("parallel",)),
        input_output_aliases={2: 0},
    )(scale, b2, x2)
    if Lp != L:
        out2 = out2[:, :L]
    return out2.reshape(N, C, H, W)


if __name__ == "__main__":
    key = jax.random.PRNGKey(0)
    fwd = jax.jit(wscale_forward)

    cases = [
        (2, 4, 16, 16),    # HW % 128 == 0, C not multiple of 8 -> "nc" layout, full-C block
        (2, 16, 16, 16),   # HW % 128 == 0, C multiple of 8     -> "nc" layout, tiled C, grid (1, 2)
        (2, 32, 4, 4),     # small spatial map (ProgGAN 4x4)    -> "lanes" layout, C folded into lanes
        (2, 3, 5, 5),      # odd shape                          -> "lanes" layout with lane padding
    ]
    for (N, C, H, W) in cases:
        k_x, k_s, k_b, key = jax.random.split(key, 4)
        x = jax.random.normal(k_x, (N, C, H, W), dtype=jnp.float32)
        scale = jax.random.normal(k_s, (1,), dtype=jnp.float32)
        b = jax.random.normal(k_b, (C,), dtype=jnp.float32)

        # Reference (same semantics as WScaleLayer.forward), computed before the kernel.
        y_ref = x * scale[0] + b.reshape(1, C, 1, 1)

        y = jax.block_until_ready(fwd(x, scale, b))
        assert jnp.allclose(y, y_ref, atol=1e-6, rtol=1e-6), f"mismatch for shape {(N, C, H, W)}"

    print("KERNEL_OK")
</pallas_src>

<mosaic_0001>
module attributes {stable_mosaic.version = 11 : i64} {
  func.func @_wscale_kernel(%arg0: i32, %arg1: i32, %arg2: memref<1xf32, #tpu.memory_space<smem>>, %arg3: memref<1x4x1xf32, #tpu.memory_space<vmem>>, %arg4: memref<1x4x256xf32, #tpu.memory_space<vmem>>, %arg5: memref<1x4x256xf32, #tpu.memory_space<vmem>>) attributes {dimension_semantics = [#tpu.dimension_semantics<parallel>, #tpu.dimension_semantics<parallel>], iteration_bounds = array<i64: 1, 2>, scalar_prefetch = 0 : i64, scratch_operands = 0 : i64, tpu.core_type = #tpu.core_type<tc>, window_params = [{transform_indices = @transform_0, window_bounds = array<i64: 1>}, {transform_indices = @transform_1, window_bounds = array<i64: 1, 4, 1>}, {transform_indices = @transform_2, window_bounds = array<i64: 1, 4, 256>}, {transform_indices = @transform_3, window_bounds = array<i64: 1, 4, 256>}]} {
    %c0 = arith.constant 0 : index
    %c0_0 = arith.constant 0 : index
    %c0_1 = arith.constant 0 : index
    %0 = vector.load %arg4[%c0, %c0_0, %c0_1] : memref<1x4x256xf32, #tpu.memory_space<vmem>>, vector<1x4x256xf32>
    %c0_2 = arith.constant 0 : index
    %1 = memref.load %arg2[%c0_2] : memref<1xf32, #tpu.memory_space<smem>>
    %2 = vector.broadcast %1 : f32 to vector<1x4x256xf32>
    %3 = arith.mulf %0, %2 : vector<1x4x256xf32>
    %c0_3 = arith.constant 0 : index
    %c0_4 = arith.constant 0 : index
    %c0_5 = arith.constant 0 : index
    %4 = vector.load %arg3[%c0_3, %c0_4, %c0_5] : memref<1x4x1xf32, #tpu.memory_space<vmem>>, vector<1x4x1xf32>
    %5 = vector.broadcast %4 : vector<1x4x1xf32> to vector<1x4x256xf32>
    %6 = arith.addf %3, %5 : vector<1x4x256xf32>
    %c0_6 = arith.constant 0 : index
    %c0_7 = arith.constant 0 : index
    %c0_8 = arith.constant 0 : index
    %7 = vector.load %arg5[%c0_6, %c0_7, %c0_8] : memref<1x4x256xf32, #tpu.memory_space<vmem>>, vector<1x4x256xf32>
    tpu.vector_store %arg5[%c0_6, %c0_7, %c0_8], %6 {strides = array<i32>} : memref<1x4x256xf32, #tpu.memory_space<vmem>>, vector<1x4x256xf32>,
    return
  }
  func.func @transform_0(%arg0: i32, %arg1: i32) -> i32 {
    %c0_i32 = arith.constant 0 : i32
    %c0_i32_0 = arith.constant 0 : i32
    return %c0_i32 : i32
  }
  func.func @transform_1(%arg0: i32, %arg1: i32) -> (i32, i32, i32) {
    %c0_i32 = arith.constant 0 : i32
    %c0_i32_0 = arith.constant 0 : i32
    %c0_i32_1 = arith.constant 0 : i32
    return %c0_i32, %arg0, %c0_i32_0 : i32, i32, i32
  }
  func.func @transform_2(%arg0: i32, %arg1: i32) -> (i32, i32, i32) {
    %c0_i32 = arith.constant 0 : i32
    %c0_i32_0 = arith.constant 0 : i32
    return %arg1, %arg0, %c0_i32 : i32, i32, i32
  }
  func.func @transform_3(%arg0: i32, %arg1: i32) -> (i32, i32, i32) {
    %c0_i32 = arith.constant 0 : i32
    %c0_i32_0 = arith.constant 0 : i32
    return %arg1, %arg0, %c0_i32 : i32, i32, i32
  }
}

</mosaic_0001>

<bundles_post_ra>
// kernel: wscale_forward.1
= control target key start
LH: loop header
LB: loop body
LE: loop exit
PB: predicated region body
PF: predicated region fallthrough
CT: control target
= control target key end

     0   :  { %s442_s14 = smov 0   ;;  %s444_s15 = smov 0   ;;  %s478_s0 = inlined_call_operand.<no memory space> [shape: f32[1], index: 0, kind: input, shape index: {}]   ;;  %s479_s1 = inlined_call_operand.vmem [shape: f32[1,4,1], index: 1, kind: input, shape index: {}]   ;;  %s480_s2 = inlined_call_operand.vmem [shape: f32[2,4,256], index: 2, kind: input, shape index: {}, may-alias: {2,3}]   ;;  %s481_s3 = inlined_call_operand.vmem [shape: f32[2,4,256], index: 3, kind: output, shape index: {}, may-alias: {2,3}]  }
   0x1   :  { %8 = sst [smem:[#allocation2]] %s478_s0  ;;  %s446_s16 = smov 0  }
   0x2 LB: > { %s23_s0 = sadd.s32 1, %s411_s15  ;;  %p357_p0 = scmp.ge.s32.totalorder %s415_s16, 1  ;;  %s415_s16 = sphi %s446_s16, %s14_s16   ;;  %s411_s15 = sphi %s444_s15, %s483_s15   ;;  %s407_s14 = sphi %s442_s14, %s482_s14  }
   0x3   : > { %p24_p1 = scmp.ge.s32.totalorder %s23_s0, 2  ;;  %p167_p2 = scmp.lt.s32.totalorder %s415_s16, 3 }
   0x5   : > { %s485_s0 = smov (%p24_p1, %s23_s0), 0  ;;  %p168_p3 = pnand %p357_p0, %p167_p2 }
   0x6   : > { %v229_v0 = vld [vmem:[%s479_s1] sm:$0xf] (!%p168_p3)  ;;  %v417_v1 = vmov (!%p168_p3), 0   ;;  %p207_p4 = scmp.lt.s32.totalorder (!%p168_p3), %s407_s14, 1  ;;  %s226_s19 = sld [smem:[#allocation2]] (!%p168_p3)  ;;  %v237_v4 = vlaneseq (!%p168_p3) }
   0x7   : > { %171 = sbr.rel (%p168_p3) target bundleno = 141 (0x8d), region = 32  ;;  %392 = vset.pattern.permute.xlu0 (!%p168_p3), %v417_v1  ;;  %v418_v2 = vmov (!%p168_p3), 839922192  }
   0x8   : > { %232 = vperm.xlu0 (!%p168_p3), %392, %v229_v0   ;;  %v235_v3 = vunpack.c.l.s4 (!%p168_p3), %v418_v2  ;;  %v238_v6 = vshrl.u32 (!%p168_p3), %v237_v4, 7 }
   0xa   : > { %v236_v5 = vunpack.c.0.s8 (!%p168_p3), %v235_v3 }
   0xc   : > { %v227_v8 = vstv (!%p168_p3), %s226_s19  ;;  %v239_v9 = vsub.s32 (!%p168_p3), %v236_v5, %v238_v6 }
   0xe   : > { %s487_s14 = smov (!%p207_p4, %s407_s14), 1 }
   0xf   : > { %s364_s20 = sshll.u32 %s487_s14, 3 }
  0x10   : > { %s215_s23 = scalar_lea.vmem %s480_s2, %s364_s20  ;;  %s224_s26 = scalar_lea.vmem %s481_s3, %s364_s20 }
  0x11   : > { %v225_v7 = vld [vmem:[%s215_s23] sm:$0xff] }
  0x12   : > { %v228_v10 = vmul.f32 %v227_v8, %v225_v7 }
  0x87   : > { %v233_v11 = vpop.permute.xlu0 %232 }
  0x88   : > { %v240_v12 = vrot.slane %v233_v11, %v239_v9 }
  0x8a   : > { %v242_v13 = vadd.f32 %v240_v12, %v228_v10 }
  0x8c   : > { %243 = vst [vmem:[%s224_s26] sm:$0xff] %v242_v13 }
  0x8d PF: > { %s14_s16 = sadd.s32 1, %s415_s16   ;;  %s482_s14 = smov %s411_s15 }
  0x8e   : > { %p11_p5 = scmp.ge.s32.totalorder %s14_s16, 4   ;;  %s483_s15 = smov %s485_s0 }
  0x90   :  { %13 = sbr.rel (!%p11_p5) target bundleno = 2 (0x2), region = 65 }

</bundles_post_ra>
